<compile_context>
chip_gen: v6e
topology: v6e:2x2x1
jax: 0.10.0
libtpu: 0.0.40
codegen_flags: <defaults>
</compile_context>

<pallas_src>
import functools

import jax
import jax.numpy as jnp
from jax.experimental import pallas as pl
from jax.experimental.pallas import tpu as pltpu


def _round_up(x, m):
    return ((x + m - 1) // m) * m


def _pairwise_interaction_kernel(x_ref, w_ref, o_ref, *, num_domains, emb_dim):
    """sum_{i<j} (x_i * x_j) @ W[k] for one batch tile.

    x_ref: (TB, num_domains * emb_dim)  lane-dense flattened rows
    w_ref: (K, emb_dim)
    o_ref: (TB, 1)
    """
    E = emb_dim
    tb = x_ref.shape[0]

    # Load W once per tile (tiny); upcast to f32 for accumulation accuracy.
    w = w_ref[...].astype(jnp.float32)                      # (K, E)

    # Load each domain's lane sub-range of the flattened row exactly once.
    xs = [x_ref[:, i * E:(i + 1) * E].astype(jnp.float32)
          for i in range(num_domains)]                      # each (TB, E)

    # Elementwise accumulate all pairs (VPU); single reduce at the end (XLU).
    acc = jnp.zeros((tb, E), dtype=jnp.float32)
    k = 0
    for i in range(num_domains):
        for j in range(i + 1, num_domains):
            acc = acc + xs[i] * xs[j] * w[k:k + 1, :]
            k += 1

    o_ref[...] = jnp.sum(acc, axis=-1, keepdims=True).astype(o_ref.dtype)


def linear_classifier_bEF_forward(x, W, num_domains, *, batch_tile=2048):
    """x: [B, num_domains, emb_dim] (f32 or bf16), W: [K, emb_dim] -> [B] f32."""
    B, D, E = x.shape
    K = W.shape[0]
    assert D == num_domains
    assert K == num_domains * (num_domains - 1) // 2

    # Lane-dense flatten; for a contiguous [B, D, E] this is a free reshape.
    x2d = x.reshape(B, D * E)

    # Batch tile: multiple of 8 (sublanes), no larger than the (rounded) batch.
    tb = min(batch_tile, _round_up(B, 8))
    tb = _round_up(tb, 8)
    grid = (pl.cdiv(B, tb),)  # partial last tile handled by Pallas masking

    out = pl.pallas_call(
        functools.partial(_pairwise_interaction_kernel,
                          num_domains=num_domains, emb_dim=E),
        out_shape=jax.ShapeDtypeStruct((B, 1), jnp.float32),
        grid=grid,
        in_specs=[
            pl.BlockSpec((tb, D * E), lambda b: (b, 0)),
            pl.BlockSpec((K, E), lambda b: (0, 0)),
        ],
        out_specs=pl.BlockSpec((tb, 1), lambda b: (b, 0)),
        compiler_params=pltpu.CompilerParams(
            dimension_semantics=("parallel",),
            vmem_limit_bytes=32 * 1024 * 1024,
        ),
    )(x2d, W)
    return out[:, 0]


def _reference_forward(x, W, num_domains):
    """Pure-JAX mirror of the torch forward for validation."""
    terms = []
    k = 0
    for i in range(num_domains):
        for j in range(i + 1, num_domains):
            x1x2 = x[:, i, :] * x[:, j, :]
            terms.append(jnp.matmul(x1x2, W[k]))
            k += 1
    return jnp.sum(jnp.stack(terms, axis=-1), axis=-1)


if __name__ == "__main__":
    # Module config: num_domains=4, emb_dim=32 -> K = 4*3/2 = 6. batch=8.
    num_domains = 4
    emb_dim = 32
    batch = 8
    K = num_domains * (num_domains - 1) // 2

    key = jax.random.PRNGKey(0)
    kx, kw = jax.random.split(key)

    # Deterministic synthetic parameter (torch.normal(mean=0, std=1, [K, emb_dim])).
    W = jax.random.normal(kw, (K, emb_dim), dtype=jnp.float32)
    # Input x: [B, num_domains, emb_dim]
    x = jax.random.normal(kx, (batch, num_domains, emb_dim), dtype=jnp.float32)

    y = linear_classifier_bEF_forward(x, W, num_domains)
    y = jax.block_until_ready(y)

    y_ref = _reference_forward(x, W, num_domains)
    assert y.shape == (batch,)
    assert jnp.allclose(y, y_ref, atol=1e-4, rtol=1e-4), (y, y_ref)

    # TODO(synk): training (fit/train_iter/Adam) and the sklearn OneHot-based
    # binary-feature scoring path are host-side and not part of this kernel.
    print("KERNEL_OK")
</pallas_src>

<mosaic_0001>
module attributes {stable_mosaic.version = 11 : i64} {
  func.func @_pairwise_interaction_kernel(%arg0: i32, %arg1: memref<8x128xf32, #tpu.memory_space<vmem>>, %arg2: memref<6x32xf32, #tpu.memory_space<vmem>>, %arg3: memref<8x1xf32, #tpu.memory_space<vmem>>) attributes {dimension_semantics = [#tpu.dimension_semantics<parallel>], iteration_bounds = array<i64: 1>, scalar_prefetch = 0 : i64, scratch_operands = 0 : i64, tpu.core_type = #tpu.core_type<tc>, window_params = [{transform_indices = @transform_0, window_bounds = array<i64: 8, 128>}, {pipeline_mode = #tpu.pipeline_mode<synchronous>, transform_indices = @transform_1, window_bounds = array<i64: 6, 32>}, {transform_indices = @transform_2, window_bounds = array<i64: 8, 1>}]} {
    %c0 = arith.constant 0 : index
    %c0_0 = arith.constant 0 : index
    %0 = vector.load %arg2[%c0, %c0_0] : memref<6x32xf32, #tpu.memory_space<vmem>>, vector<6x32xf32>
    %c0_1 = arith.constant 0 : index
    %c0_2 = arith.constant 0 : index
    %1 = vector.load %arg1[%c0_1, %c0_2] : memref<8x128xf32, #tpu.memory_space<vmem>>, vector<8x32xf32>
    %c0_3 = arith.constant 0 : index
    %c32 = arith.constant 32 : index
    %2 = vector.load %arg1[%c0_3, %c32] : memref<8x128xf32, #tpu.memory_space<vmem>>, vector<8x32xf32>
    %c0_4 = arith.constant 0 : index
    %c64 = arith.constant 64 : index
    %3 = vector.load %arg1[%c0_4, %c64] : memref<8x128xf32, #tpu.memory_space<vmem>>, vector<8x32xf32>
    %c0_5 = arith.constant 0 : index
    %c96 = arith.constant 96 : index
    %4 = vector.load %arg1[%c0_5, %c96] : memref<8x128xf32, #tpu.memory_space<vmem>>, vector<8x32xf32>
    %cst = arith.constant 0.000000e+00 : f32
    %5 = vector.broadcast %cst : f32 to vector<8x32xf32>
    %6 = arith.mulf %1, %2 : vector<8x32xf32>
    %7 = vector.extract_strided_slice %0 {offsets = [0, 0], sizes = [1, 32], strides = [1, 1]} : vector<6x32xf32> to vector<1x32xf32>
    %8 = vector.broadcast %7 : vector<1x32xf32> to vector<8x32xf32>
    %9 = arith.mulf %6, %8 : vector<8x32xf32>
    %10 = arith.addf %5, %9 : vector<8x32xf32>
    %11 = arith.mulf %1, %3 : vector<8x32xf32>
    %12 = vector.extract_strided_slice %0 {offsets = [1, 0], sizes = [1, 32], strides = [1, 1]} : vector<6x32xf32> to vector<1x32xf32>
    %13 = vector.broadcast %12 : vector<1x32xf32> to vector<8x32xf32>
    %14 = arith.mulf %11, %13 : vector<8x32xf32>
    %15 = arith.addf %10, %14 : vector<8x32xf32>
    %16 = arith.mulf %1, %4 : vector<8x32xf32>
    %17 = vector.extract_strided_slice %0 {offsets = [2, 0], sizes = [1, 32], strides = [1, 1]} : vector<6x32xf32> to vector<1x32xf32>
    %18 = vector.broadcast %17 : vector<1x32xf32> to vector<8x32xf32>
    %19 = arith.mulf %16, %18 : vector<8x32xf32>
    %20 = arith.addf %15, %19 : vector<8x32xf32>
    %21 = arith.mulf %2, %3 : vector<8x32xf32>
    %22 = vector.extract_strided_slice %0 {offsets = [3, 0], sizes = [1, 32], strides = [1, 1]} : vector<6x32xf32> to vector<1x32xf32>
    %23 = vector.broadcast %22 : vector<1x32xf32> to vector<8x32xf32>
    %24 = arith.mulf %21, %23 : vector<8x32xf32>
    %25 = arith.addf %20, %24 : vector<8x32xf32>
    %26 = arith.mulf %2, %4 : vector<8x32xf32>
    %27 = vector.extract_strided_slice %0 {offsets = [4, 0], sizes = [1, 32], strides = [1, 1]} : vector<6x32xf32> to vector<1x32xf32>
    %28 = vector.broadcast %27 : vector<1x32xf32> to vector<8x32xf32>
    %29 = arith.mulf %26, %28 : vector<8x32xf32>
    %30 = arith.addf %25, %29 : vector<8x32xf32>
    %31 = arith.mulf %3, %4 : vector<8x32xf32>
    %32 = vector.extract_strided_slice %0 {offsets = [5, 0], sizes = [1, 32], strides = [1, 1]} : vector<6x32xf32> to vector<1x32xf32>
    %33 = vector.broadcast %32 : vector<1x32xf32> to vector<8x32xf32>
    %34 = arith.mulf %31, %33 : vector<8x32xf32>
    %35 = arith.addf %30, %34 : vector<8x32xf32>
    %cst_6 = arith.constant dense<0.000000e+00> : vector<8xf32>
    %36 = vector.multi_reduction <add>, %35, %cst_6 [1] : vector<8x32xf32> to vector<8xf32>
    %37 = vector.shape_cast %36 : vector<8xf32> to vector<8x1xf32>
    %c0_7 = arith.constant 0 : index
    %c0_8 = arith.constant 0 : index
    %38 = vector.load %arg3[%c0_7, %c0_8] : memref<8x1xf32, #tpu.memory_space<vmem>>, vector<8x1xf32>
    tpu.vector_store %arg3[%c0_7, %c0_8], %37 {strides = array<i32>} : memref<8x1xf32, #tpu.memory_space<vmem>>, vector<8x1xf32>,
    return
  }
  func.func @transform_0(%arg0: i32) -> (i32, i32) {
    %c0_i32 = arith.constant 0 : i32
    %c0_i32_0 = arith.constant 0 : i32
    return %arg0, %c0_i32 : i32, i32
  }
  func.func @transform_1(%arg0: i32) -> (i32, i32) {
    %c0_i32 = arith.constant 0 : i32
    %c0_i32_0 = arith.constant 0 : i32
    %c0_i32_1 = arith.constant 0 : i32
    return %c0_i32, %c0_i32_0 : i32, i32
  }
  func.func @transform_2(%arg0: i32) -> (i32, i32) {
    %c0_i32 = arith.constant 0 : i32
    %c0_i32_0 = arith.constant 0 : i32
    return %arg0, %c0_i32 : i32, i32
  }
}

</mosaic_0001>

<bundles_post_ra>
// kernel: tpu_custom_call.1
= control target key start
LH: loop header
LB: loop body
LE: loop exit
PB: predicated region body
PF: predicated region fallthrough
CT: control target
= control target key end

     0   :  { %7 = vsyncpa [#allocation3], 0  ;;  %s200_s0 = inlined_call_operand.hbm [shape: f32[8,128], index: 0, kind: input, shape index: {}]   ;;  %s201_s1 = inlined_call_operand.hbm [shape: f32[6,32], index: 1, kind: input, shape index: {}]   ;;  %s202_s2 = inlined_call_operand.vmem [shape: f32[8,1], index: 2, kind: output, shape index: {}]  }
   0x1   :  { %8 = vsyncpa [#allocation5], 0  ;;  %s171_s9 = smov [#allocation2]   ;;  %s172_s11 = smov [#allocation4]  }
   0x2   :  { %s15_s10 = sshll.u32 %s171_s9, 4  ;;  %s25_s12 = sshll.u32 %s172_s11, 4  ;;  %s16_s10 = int_to_ptr.vmem [resolvable:$true] %s15_s10  ;;  %s26_s12 = int_to_ptr.vmem [resolvable:$true] %s25_s12 }
   0x3   :  { %s135_s13 = scalar_lea.vmem %s16_s10, 128  ;;  %p140_p1 = scmp.lt.s32.totalorder %s16_s10, %s16_s10 }
   0x4   :  { %p136_p0 = scmp.ne.s32.totalorder %s16_s10, %s135_s13  ;;  %p141_p2 = scmp.lt.s32.totalorder %s135_s13, %s135_s13 }
   0x6   :  { %p142_p3 = por %p141_p2, %p140_p1 }
   0x8   :  { %p143_p4 = pnand %p142_p3, %p136_p0 }
   0xa   :  { %146 = shalt.err (!%p143_p4)
}
   0xb   :  { %18 = dma.hbm_to_vmem [thread:$0]  %s200_s0, 128, %s16_s10, [#allocation3]  }
   0xc   :  { %s155_s16 = scalar_lea.vmem %s26_s12, 128  ;;  %p160_p6 = scmp.lt.s32.totalorder %s26_s12, %s26_s12 }
   0xd   :  { %p156_p5 = scmp.ne.s32.totalorder %s26_s12, %s155_s16  ;;  %p161_p7 = scmp.lt.s32.totalorder %s155_s16, %s155_s16 }
   0xf   :  { %p162_p8 = por %p161_p7, %p160_p6 }
  0x11   :  { %p163_p9 = pnand %p162_p8, %p156_p5 }
  0x13   :  { %166 = shalt.err (!%p163_p9)
}
  0x14   :  { %28 = dma.hbm_to_vmem [thread:$0]  %s201_s1, 128, %s26_s12, [#allocation5]  }
  0x15   :  { %167 = dma.done.wait [#allocation3], 128  }
  0x16   :  { %168 = vsyncadd [#allocation3], 4294967168 }
  0x17   :  { %169 = dma.done.wait [#allocation5], 128  }
  0x18   :  { %170 = vsyncadd [#allocation5], 4294967168  ;;  %v42_v0 = vlaneseq  ;;  %v36_v7 = vld [vmem:[#allocation2] sm:$0xff]  ;;  %v35_v8 = vld [vmem:[#allocation4] sm:$0x3f]  ;;  %s173_s0 = smov 96  }
  0x19   :  { %38 = vrot.lane.b32.xlu0 %v36_v7, %s173_s0  ;;  %s174_s1 = smov 32   ;;  %s175_s19 = smov 64   ;;  %vm110_vm0 = vcmask 261120   ;;  %vm114_vm1 = vcmask 7168  }
  0x1a   :  { %v43_v1 = vshrl.u32 %v42_v0, 7 }
  0x1c   :  { %v70_v2 = vsub.s32 3, %v43_v1  ;;  %v44_v3 = vsub.s32 0, %v43_v1  ;;  %v54_v4 = vsub.s32 1, %v43_v1  ;;  %v64_v5 = vsub.s32 2, %v43_v1 }
  0x1d   :  { %v84_v6 = vsub.s32 4, %v43_v1  ;;  %v98_v10 = vsub.s32 5, %v43_v1  ;;  %48 = vrot.lane.b32.xlu0 %v36_v7, %s175_s19 }
  0x1e   :  { %v71_v9 = vrot.slane %v35_v8, %v70_v2  ;;  %v45_v11 = vrot.slane %v35_v8, %v44_v3  ;;  %v55_v12 = vrot.slane %v35_v8, %v54_v4  ;;  %v65_v13 = vrot.slane %v35_v8, %v64_v5 }
  0x1f   :  { %v85_v14 = vrot.slane %v35_v8, %v84_v6  ;;  %v99_v15 = vrot.slane %v35_v8, %v98_v10 }
  0x20   :  { %73 = vrot.lane.b32.xlu1 %v71_v9, %s174_s1 }
  0x21   :  { %101 = vrot.lane.b32.xlu0 %v99_v15, %s175_s19 }
  0x24   :  { %87 = vrot.lane.b32.xlu1 %v85_v14, %s174_s1 }
  0x28   :  { %58 = vrot.lane.b32.xlu1 %v36_v7, %s174_s1 }
  0x8b   :  { %v39_v16 = vpop.permute.xlu0 %38 }
  0x8c   :  { %v41_v17 = vmul.f32 %v39_v16, %v36_v7 }
  0x8e   :  { %v46_v19 = vmul.f32 %v45_v11, %v41_v17 }
  0x8f   :  { %v49_v21 = vpop.permute.xlu0 %48 }
  0x90   :  { %v51_v22 = vmul.f32 %v49_v21, %v36_v7 }
  0x92   :  { %v74_v18 = vpop.permute.xlu1 %73  ;;  %v56_v24 = vmul.f32 %v55_v12, %v51_v22 }
  0x93   :  { %v76_v20 = vmul.f32 %v74_v18, %v41_v17  ;;  %v102_v26 = vpop.permute.xlu0 %101 }
  0x94   :  { %v104_v27 = vmul.f32 %v102_v26, %v41_v17  ;;  %v57_v28 = vadd.f32 %v56_v24, %v46_v19 }
  0x95   :  { %78 = vrot.lane.b32.xlu0 %v76_v20, %s173_s0 }
  0x96   :  { %v88_v23 = vpop.permute.xlu1 %87 }
  0x97   :  { %v90_v25 = vmul.f32 %v88_v23, %v51_v22 }
  0x99   :  { %92 = vrot.lane.b32.xlu1 %v90_v25, %s173_s0  ;;  %106 = vrot.lane.b32.xlu0 %v104_v27, %s175_s19 }
  0x9a   :  { %v59_v29 = vpop.permute.xlu1 %58 }
  0x9b   :  { %v61_v30 = vmul.f32 %v59_v29, %v36_v7 }
  0x9d   :  { %v66_v31 = vmul.f32 %v65_v13, %v61_v30 }
  0x9f   :  { %v67_v32 = vadd.f32 %v66_v31, %v57_v28 }
 0x107   :  { %v79_v33 = vpop.permute.xlu0 %78 }
 0x108   :  { %v81_v34 = vadd.f32 %v79_v33, %v67_v32 }
 0x10b   :  { %v93_v35 = vpop.permute.xlu1 %92  ;;  %v107_v37 = vpop.permute.xlu0 %106 }
 0x10c   :  { %v95_v36 = vadd.f32 %v93_v35, %v81_v34 }
 0x10e   :  { %v109_v38 = vadd.f32 %v107_v37, %v95_v36 }
 0x110   :  { %v111_v39 = vsel %vm110_vm0, %v109_v38, 0.0 }
 0x111   :  { %112 = vadd.xlane.f32.xlu1 %v111_v39 }
 0x19a   :  { %v113_v40 = vpop.xlane.xlu1 %112 }
 0x19b   :  { %115 = vst.msk [vmem:[%s202_s2] sm:$0xff] %vm114_vm1, %v113_v40 }
 0x19c   :  { %120 = vsyncpa [#allocation3], 1 }
 0x19d   :  { %121 = vsyncpa [#allocation5], 1 }

</bundles_post_ra>
